<compile_context>
chip_gen: v6e
topology: v6e:2x2x1
jax: 0.10.0
libtpu: 0.0.40
codegen_flags: <defaults>
</compile_context>

<pallas_src>
import jax
import jax.numpy as jnp
from jax.experimental import pallas as pl
from jax.experimental.pallas import tpu as pltpu

_EPS = 1e-12  # F.normalize default eps


def _round_up(x, m):
    return ((x + m - 1) // m) * m


def _cdiv(a, b):
    return -(-a // b)


def _finish(h_lin, b1, w2, b2, o_ref, compute_dtype):
    """bias+ReLU -> L2-norm -> fc2 -> bias+ReLU -> L2-norm -> store (all f32 math)."""
    h = jnp.maximum(h_lin + b1, 0.0)
    # F.normalize: h / max(||h||, eps) == h * rsqrt(max(||h||^2, eps^2)); rsqrt
    # lands on the EUP slot, the divide becomes a VPU multiply.
    h = h * jax.lax.rsqrt(jnp.maximum(jnp.sum(h * h, axis=1, keepdims=True),
                                      _EPS * _EPS))
    y = jnp.dot(h.astype(compute_dtype), w2,
                preferred_element_type=jnp.float32) + b2
    y = jnp.maximum(y, 0.0)
    y = y * jax.lax.rsqrt(jnp.maximum(jnp.sum(y * y, axis=1, keepdims=True),
                                      _EPS * _EPS))
    o_ref[...] = y.astype(o_ref.dtype)


def _make_kernel(n_k, compute_dtype):
    if n_k == 1:
        # fc1 weight fully VMEM-resident; no accumulator scratch needed.
        def kernel(x_ref, w1_ref, b1_ref, w2_ref, b2_ref, o_ref):
            x = x_ref[...].astype(compute_dtype)   # in-kernel cast, no HBM pre-pass
            h_lin = jnp.dot(x, w1_ref[...], preferred_element_type=jnp.float32)
            _finish(h_lin, b1_ref[...], w2_ref[...], b2_ref[...], o_ref,
                    compute_dtype)
        return kernel

    # K-tiled fc1: stream (tk, out_p) weight tiles, accumulate in f32 VMEM.
    def kernel(x_ref, w1_ref, b1_ref, w2_ref, b2_ref, o_ref, acc_ref):
        k = pl.program_id(1)

        @pl.when(k == 0)
        def _():
            acc_ref[...] = jnp.zeros_like(acc_ref)

        x = x_ref[...].astype(compute_dtype)
        acc_ref[...] += jnp.dot(x, w1_ref[...], preferred_element_type=jnp.float32)

        @pl.when(k == n_k - 1)
        def _():
            _finish(acc_ref[...], b1_ref[...], w2_ref[...], b2_ref[...], o_ref,
                    compute_dtype)
    return kernel


def proj_and_deci(x, w1, b1, w2, b2, *, tile_b=256, max_k=512,
                  compute_dtype=jnp.bfloat16, out_dtype=jnp.float32):
    """ProjandDeci forward.

    x  : [B, in_d]
    w1 : [in_d, out_d]        (fc1 weight, pre-transposed from PyTorch [out, in])
    b1 : [out_d]
    w2 : [out_d, num_classes]
    b2 : [num_classes]
    Returns [B, num_classes] in out_dtype.
    """
    f32 = jnp.float32
    B, in_d = x.shape
    assert w1.shape[0] == in_d
    out_d = w1.shape[1]
    assert w2.shape[0] == out_d
    num_classes = w2.shape[1]

    # ---- lane padding (128) of feature dims.  Zero padding is exact: padded
    # ---- columns are 0 after ReLU, so the row-wise L2 norms are unchanged.
    out_p = _round_up(out_d, 128)
    c_p = _round_up(num_classes, 128)

    # ---- K tiling of in_d (fc1 contraction).  n_k == 1 keeps W1 resident.
    in_p0 = _round_up(in_d, 128)
    n_k = max(1, _cdiv(in_p0, max_k))
    tk = _round_up(_cdiv(in_p0, n_k), 128)
    in_p = tk * n_k

    # ---- batch tiling sized so the zero padding stays within one
    # ---- 8-row-aligned tile of B (avoids up to ~2x wasted MXU/DMA work).
    # ---- v5e: 128-row tiles already fill its 4x128x128 MXU; v6e/v7x prefer
    # ---- 256-row tiles (256x256 MXU).  Sweep tile_b per generation.
    n_b = max(1, _cdiv(B, tile_b))
    tile_b_eff = _round_up(_cdiv(B, n_b), 8)
    b_pad = tile_b_eff * n_b

    # ---- pad / cast parameters (skipped when already aligned + right dtype).
    def _pad2(a, r, c, dt):
        if a.shape == (r, c) and a.dtype == dt:
            return a
        return jnp.zeros((r, c), dt).at[:a.shape[0], :a.shape[1]].set(a.astype(dt))

    w1_p = _pad2(w1, in_p, out_p, compute_dtype)
    w2_p = _pad2(w2, out_p, c_p, compute_dtype)
    b1_p = _pad2(b1.reshape(1, -1), 1, out_p, f32)
    b2_p = _pad2(b2.reshape(1, -1), 1, c_p, f32)

    # x stays in its original dtype (cast in-kernel); pad only when necessary
    # so the aligned case streams straight from HBM with no extra pass.
    if (b_pad, in_p) == (B, in_d):
        x_p = x
    else:
        x_p = jnp.zeros((b_pad, in_p), x.dtype).at[:B, :in_d].set(x)

    kernel = _make_kernel(n_k, compute_dtype)
    scratch_shapes = [] if n_k == 1 else [pltpu.VMEM((tile_b_eff, out_p), f32)]

    # Constant index_map => fetched once and kept resident; one buffer suffices.
    resident = dict(pipeline_mode=pl.Buffered(1))
    in_specs = [
        pl.BlockSpec((tile_b_eff, tk), lambda i, k: (i, k)),              # streamed x
        pl.BlockSpec((tk, out_p), lambda i, k: (k, 0),
                     **(resident if n_k == 1 else {})),                   # W1
        pl.BlockSpec((1, out_p), lambda i, k: (0, 0), **resident),        # b1
        pl.BlockSpec((out_p, c_p), lambda i, k: (0, 0), **resident),      # W2
        pl.BlockSpec((1, c_p), lambda i, k: (0, 0), **resident),          # b2
    ]
    out_spec = pl.BlockSpec((tile_b_eff, c_p), lambda i, k: (i, 0))       # lane-dense

    # ---- explicit VMEM budget: double-buffered x/out tiles, single-buffered
    # ---- resident params, streamed W1 tiles, f32 accumulator; + headroom for
    # ---- Mosaic internal scratch.  Capped at v7x's 64 MiB physical VMEM.
    c_size = jnp.dtype(compute_dtype).itemsize
    x_size = jnp.dtype(x_p.dtype).itemsize
    o_size = jnp.dtype(out_dtype).itemsize
    w1_bufs = 1 if n_k == 1 else 2
    footprint = (
        2 * tile_b_eff * tk * x_size
        + w1_bufs * tk * out_p * c_size
        + out_p * 4 + out_p * c_p * c_size + c_p * 4
        + 2 * tile_b_eff * c_p * o_size
        + (tile_b_eff * out_p * 4 if n_k > 1 else 0)
    )
    vmem_limit = int(min(64 * 2**20,
                         max(int(1.4 * footprint) + 4 * 2**20, 24 * 2**20)))

    cost = pl.CostEstimate(
        flops=2 * b_pad * (in_p * out_p + out_p * c_p),
        transcendentals=2 * b_pad,  # two rsqrts per row
        bytes_accessed=(b_pad * in_p * x_size + in_p * out_p * c_size
                        + out_p * c_p * c_size + out_p * 4 + c_p * 4
                        + b_pad * c_p * o_size),
    )

    out_padded = pl.pallas_call(
        kernel,
        out_shape=jax.ShapeDtypeStruct((b_pad, c_p), out_dtype),
        grid_spec=pltpu.PrefetchScalarGridSpec(
            num_scalar_prefetch=0,
            grid=(n_b, n_k),
            in_specs=in_specs,
            out_specs=out_spec,
            scratch_shapes=scratch_shapes,
        ),
        compiler_params=pltpu.CompilerParams(
            # Batch axis is independent (megacore-shardable on v7x; harmless
            # no-op on single-TC v5e/v6e); K axis is a reduction.
            dimension_semantics=("parallel", "arbitrary"),
            vmem_limit_bytes=vmem_limit,
        ),
        cost_estimate=cost,
    )(x_p, w1_p, b1_p, w2_p, b2_p)

    if (b_pad, c_p) != (B, num_classes):
        out_padded = out_padded[:B, :num_classes]
    return out_padded


def _reference(x, w1, b1, w2, b2):
    hp = jax.lax.Precision.HIGHEST
    h = jnp.maximum(jnp.dot(x, w1, precision=hp) + b1, 0.0)
    h = h / jnp.maximum(jnp.linalg.norm(h, axis=1, keepdims=True), _EPS)
    y = jnp.maximum(jnp.dot(h, w2, precision=hp) + b2, 0.0)
    y = y / jnp.maximum(jnp.linalg.norm(y, axis=1, keepdims=True), _EPS)
    return y


if __name__ == "__main__":
    key = jax.random.PRNGKey(0)
    B, in_d, out_d, num_classes = 8, 32, 64, 16
    k_x, k_w1, k_b1, k_w2, k_b2, k_x2, k_w1b = jax.random.split(key, 7)

    x = jax.random.normal(k_x, (B, in_d), dtype=jnp.float32)
    # Deterministic parameter init (Kaiming-uniform-ish scaling like nn.Linear).
    w1 = jax.random.uniform(k_w1, (in_d, out_d), jnp.float32, -1.0, 1.0) / jnp.sqrt(in_d)
    b1 = jax.random.uniform(k_b1, (out_d,), jnp.float32, -1.0, 1.0) / jnp.sqrt(in_d)
    w2 = jax.random.uniform(k_w2, (out_d, num_classes), jnp.float32, -1.0, 1.0) / jnp.sqrt(out_d)
    b2 = jax.random.uniform(k_b2, (num_classes,), jnp.float32, -1.0, 1.0) / jnp.sqrt(out_d)

    ref = _reference(x, w1, b1, w2, b2)

    # Default path: bf16 matmul inputs, f32 accumulation + f32 normalization.
    out = jax.block_until_ready(proj_and_deci(x, w1, b1, w2, b2))
    assert out.shape == (B, num_classes)
    assert jnp.allclose(out, ref, atol=3e-2, rtol=3e-2), "bf16 path mismatch vs reference"

    # f32 matmul path: tighter check.
    out_f32 = jax.block_until_ready(
        proj_and_deci(x, w1, b1, w2, b2, compute_dtype=jnp.float32))
    assert out_f32.shape == (B, num_classes)
    assert jnp.allclose(out_f32, ref, atol=5e-3, rtol=5e-3), "f32 path mismatch vs reference"

    # Unaligned batch + K-tiled fc1 (exercises padding logic and the f32 VMEM
    # accumulator / pl.when init-finalize path).
    B2, in_d2 = 10, 200
    x2 = jax.random.normal(k_x2, (B2, in_d2), dtype=jnp.float32)
    w1b = jax.random.uniform(k_w1b, (in_d2, out_d), jnp.float32, -1.0, 1.0) / jnp.sqrt(in_d2)
    ref2 = _reference(x2, w1b, b1, w2, b2)
    out2 = jax.block_until_ready(
        proj_and_deci(x2, w1b, b1, w2, b2, compute_dtype=jnp.float32, max_k=128))
    assert out2.shape == (B2, num_classes)
    assert jnp.allclose(out2, ref2, atol=5e-3, rtol=5e-3), "K-tiled path mismatch vs reference"

    # TODO(synk): on v7x, consider fp8 weights (W1/W2) if the accuracy budget allows.
    print("KERNEL_OK")
</pallas_src>

<mosaic_0001>
module attributes {stable_mosaic.version = 11 : i64} {
  func.func @kernel(%arg0: i32, %arg1: i32, %arg2: memref<8x128xf32, #tpu.memory_space<vmem>>, %arg3: memref<128x128xbf16, #tpu.memory_space<vmem>>, %arg4: memref<1x128xf32, #tpu.memory_space<vmem>>, %arg5: memref<128x128xbf16, #tpu.memory_space<vmem>>, %arg6: memref<1x128xf32, #tpu.memory_space<vmem>>, %arg7: memref<8x128xf32, #tpu.memory_space<vmem>>) attributes {dimension_semantics = [#tpu.dimension_semantics<parallel>, #tpu.dimension_semantics<arbitrary>], iteration_bounds = array<i64: 1, 1>, scalar_prefetch = 0 : i64, scratch_operands = 0 : i64, tpu.core_type = #tpu.core_type<tc>, window_params = [{transform_indices = @transform_0, window_bounds = array<i64: 8, 128>}, {pipeline_mode = #tpu.pipeline_mode<synchronous>, transform_indices = @transform_1, window_bounds = array<i64: 128, 128>}, {pipeline_mode = #tpu.pipeline_mode<synchronous>, transform_indices = @transform_2, window_bounds = array<i64: 1, 128>}, {pipeline_mode = #tpu.pipeline_mode<synchronous>, transform_indices = @transform_3, window_bounds = array<i64: 128, 128>}, {pipeline_mode = #tpu.pipeline_mode<synchronous>, transform_indices = @transform_4, window_bounds = array<i64: 1, 128>}, {transform_indices = @transform_5, window_bounds = array<i64: 8, 128>}]} {
    %c0 = arith.constant 0 : index
    %c0_0 = arith.constant 0 : index
    %0 = vector.load %arg2[%c0, %c0_0] : memref<8x128xf32, #tpu.memory_space<vmem>>, vector<8x128xf32>
    %1 = arith.truncf %0 : vector<8x128xf32> to vector<8x128xbf16>
    %c0_1 = arith.constant 0 : index
    %c0_2 = arith.constant 0 : index
    %2 = vector.load %arg3[%c0_1, %c0_2] : memref<128x128xbf16, #tpu.memory_space<vmem>>, vector<128x128xbf16>
    %cst = arith.constant dense<0.000000e+00> : vector<8x128xf32>
    %3 = tpu.matmul %1, %2, %cst {dimension_numbers = #tpu.dot_dimension_numbers<[1], [0], [0], [1], [0, 0, 1, 1], [], []>} : vector<8x128xbf16>, vector<128x128xbf16>, vector<8x128xf32> -> vector<8x128xf32>
    %c0_3 = arith.constant 0 : index
    %c0_4 = arith.constant 0 : index
    %4 = vector.load %arg4[%c0_3, %c0_4] : memref<1x128xf32, #tpu.memory_space<vmem>>, vector<1x128xf32>
    %c0_5 = arith.constant 0 : index
    %c0_6 = arith.constant 0 : index
    %5 = vector.load %arg5[%c0_5, %c0_6] : memref<128x128xbf16, #tpu.memory_space<vmem>>, vector<128x128xbf16>
    %c0_7 = arith.constant 0 : index
    %c0_8 = arith.constant 0 : index
    %6 = vector.load %arg6[%c0_7, %c0_8] : memref<1x128xf32, #tpu.memory_space<vmem>>, vector<1x128xf32>
    %7 = vector.broadcast %4 : vector<1x128xf32> to vector<8x128xf32>
    %8 = arith.addf %3, %7 : vector<8x128xf32>
    %cst_9 = arith.constant 0.000000e+00 : f32
    %9 = vector.broadcast %cst_9 : f32 to vector<8x128xf32>
    %10 = arith.maximumf %8, %9 : vector<8x128xf32>
    %11 = arith.mulf %10, %10 : vector<8x128xf32>
    %cst_10 = arith.constant dense<0.000000e+00> : vector<8xf32>
    %12 = vector.multi_reduction <add>, %11, %cst_10 [1] : vector<8x128xf32> to vector<8xf32>
    %13 = vector.shape_cast %12 : vector<8xf32> to vector<8x1xf32>
    %cst_11 = arith.constant 1.000000e-24 : f32
    %14 = vector.broadcast %cst_11 : f32 to vector<8x1xf32>
    %15 = arith.maximumf %13, %14 : vector<8x1xf32>
    %16 = math.rsqrt %15 : vector<8x1xf32>
    %17 = vector.broadcast %16 : vector<8x1xf32> to vector<8x128xf32>
    %18 = arith.mulf %10, %17 : vector<8x128xf32>
    %19 = arith.truncf %18 : vector<8x128xf32> to vector<8x128xbf16>
    %cst_12 = arith.constant dense<0.000000e+00> : vector<8x128xf32>
    %20 = tpu.matmul %19, %5, %cst_12 {dimension_numbers = #tpu.dot_dimension_numbers<[1], [0], [0], [1], [0, 0, 1, 1], [], []>} : vector<8x128xbf16>, vector<128x128xbf16>, vector<8x128xf32> -> vector<8x128xf32>
    %21 = vector.broadcast %6 : vector<1x128xf32> to vector<8x128xf32>
    %22 = arith.addf %20, %21 : vector<8x128xf32>
    %cst_13 = arith.constant 0.000000e+00 : f32
    %23 = vector.broadcast %cst_13 : f32 to vector<8x128xf32>
    %24 = arith.maximumf %22, %23 : vector<8x128xf32>
    %25 = arith.mulf %24, %24 : vector<8x128xf32>
    %cst_14 = arith.constant dense<0.000000e+00> : vector<8xf32>
    %26 = vector.multi_reduction <add>, %25, %cst_14 [1] : vector<8x128xf32> to vector<8xf32>
    %27 = vector.shape_cast %26 : vector<8xf32> to vector<8x1xf32>
    %cst_15 = arith.constant 1.000000e-24 : f32
    %28 = vector.broadcast %cst_15 : f32 to vector<8x1xf32>
    %29 = arith.maximumf %27, %28 : vector<8x1xf32>
    %30 = math.rsqrt %29 : vector<8x1xf32>
    %31 = vector.broadcast %30 : vector<8x1xf32> to vector<8x128xf32>
    %32 = arith.mulf %24, %31 : vector<8x128xf32>
    %c0_16 = arith.constant 0 : index
    %c0_17 = arith.constant 0 : index
    %33 = vector.load %arg7[%c0_16, %c0_17] : memref<8x128xf32, #tpu.memory_space<vmem>>, vector<8x128xf32>
    tpu.vector_store %arg7[%c0_16, %c0_17], %32 {strides = array<i32>} : memref<8x128xf32, #tpu.memory_space<vmem>>, vector<8x128xf32>,
    return
  }
  func.func @transform_0(%arg0: i32, %arg1: i32) -> (i32, i32) {
    %c0_i32 = arith.constant 0 : i32
    return %arg0, %arg1 : i32, i32
  }
  func.func @transform_1(%arg0: i32, %arg1: i32) -> (i32, i32) {
    %c0_i32 = arith.constant 0 : i32
    %c0_i32_0 = arith.constant 0 : i32
    return %arg1, %c0_i32 : i32, i32
  }
  func.func @transform_2(%arg0: i32, %arg1: i32) -> (i32, i32) {
    %c0_i32 = arith.constant 0 : i32
    %c0_i32_0 = arith.constant 0 : i32
    %c0_i32_1 = arith.constant 0 : i32
    return %c0_i32, %c0_i32_0 : i32, i32
  }
  func.func @transform_3(%arg0: i32, %arg1: i32) -> (i32, i32) {
    %c0_i32 = arith.constant 0 : i32
    %c0_i32_0 = arith.constant 0 : i32
    %c0_i32_1 = arith.constant 0 : i32
    return %c0_i32, %c0_i32_0 : i32, i32
  }
  func.func @transform_4(%arg0: i32, %arg1: i32) -> (i32, i32) {
    %c0_i32 = arith.constant 0 : i32
    %c0_i32_0 = arith.constant 0 : i32
    %c0_i32_1 = arith.constant 0 : i32
    return %c0_i32, %c0_i32_0 : i32, i32
  }
  func.func @transform_5(%arg0: i32, %arg1: i32) -> (i32, i32) {
    %c0_i32 = arith.constant 0 : i32
    %c0_i32_0 = arith.constant 0 : i32
    return %arg0, %c0_i32 : i32, i32
  }
}

</mosaic_0001>

<bundles_post_ra>
// kernel: tpu_custom_call.1
= control target key start
LH: loop header
LB: loop body
LE: loop exit
PB: predicated region body
PF: predicated region fallthrough
CT: control target
= control target key end

     0   :  { %10 = vsyncpa [#allocation3], 0  ;;  %s563_s0 = inlined_call_operand.hbm [shape: f32[8,128], index: 0, kind: input, shape index: {}]   ;;  %s564_s1 = inlined_call_operand.hbm [shape: bf16[128,128], index: 1, kind: input, shape index: {}]   ;;  %s565_s2 = inlined_call_operand.vmem [shape: f32[1,128], index: 2, kind: input, shape index: {}]   ;;  %s566_s3 = inlined_call_operand.hbm [shape: bf16[128,128], index: 3, kind: input, shape index: {}]   ;;  %s567_s4 = inlined_call_operand.vmem [shape: f32[1,128], index: 4, kind: input, shape index: {}]   ;;  %s568_s5 = inlined_call_operand.hbm [shape: f32[8,128], index: 5, kind: output, shape index: {}]  }
   0x1   :  { %11 = vsyncpa [#allocation6], 0 }
   0x2   :  { %12 = vsyncpa [#allocation4], 0  ;;  %s507_s18 = smov [#allocation5]  }
   0x3   :  { %s28_s19 = sshll.u32 %s507_s18, 4  ;;  %s29_s19 = int_to_ptr.vmem [resolvable:$true] %s28_s19 }
   0x4   :  { %s429_s20 = scalar_lea.vmem %s29_s19, 1024  ;;  %p434_p1 = scmp.lt.s32.totalorder %s29_s19, %s29_s19 }
   0x5   :  { %p430_p0 = scmp.ne.s32.totalorder %s29_s19, %s429_s20  ;;  %p435_p2 = scmp.lt.s32.totalorder %s429_s20, %s429_s20 }
   0x7   :  { %p436_p3 = por %p435_p2, %p434_p1 }
   0x9   :  { %p437_p4 = pnand %p436_p3, %p430_p0 }
   0xb   :  { %440 = shalt.err (!%p437_p4)
}
   0xc   :  { %s508_s21 = smov 64   ;;  %s509_s22 = smov 4  }
   0xd   :  { %34 = dma.hbm_to_vmem [thread:$0]  %s564_s1, 1024, %s29_s19, [#allocation6], %s508_s21, %s508_s21, %s509_s22  }
   0xe   :  { %s510_s25 = smov [#allocation2]   ;;  %s511_s27 = smov [#allocation7]  }
   0xf   :  { %s19_s26 = sshll.u32 %s510_s25, 4  ;;  %s42_s28 = sshll.u32 %s511_s27, 4  ;;  %s20_s26 = int_to_ptr.vmem [resolvable:$true] %s19_s26  ;;  %s43_s28 = int_to_ptr.vmem [resolvable:$true] %s42_s28 }
  0x10   :  { %s449_s29 = scalar_lea.vmem %s20_s26, 128  ;;  %p454_p6 = scmp.lt.s32.totalorder %s20_s26, %s20_s26 }
  0x11   :  { %p450_p5 = scmp.ne.s32.totalorder %s20_s26, %s449_s29  ;;  %p455_p7 = scmp.lt.s32.totalorder %s449_s29, %s449_s29 }
  0x13   :  { %p456_p8 = por %p455_p7, %p454_p6 }
  0x15   :  { %p457_p9 = pnand %p456_p8, %p450_p5 }
  0x17   :  { %460 = shalt.err (!%p457_p9)
}
  0x18   :  { %22 = dma.hbm_to_vmem [thread:$0]  %s563_s0, 128, %s20_s26, [#allocation3]  }
  0x19   :  { %s469_s7 = scalar_lea.vmem %s43_s28, 1024  ;;  %p474_p11 = scmp.lt.s32.totalorder %s43_s28, %s43_s28 }
  0x1a   :  { %p470_p10 = scmp.ne.s32.totalorder %s43_s28, %s469_s7  ;;  %p475_p12 = scmp.lt.s32.totalorder %s469_s7, %s469_s7 }
  0x1c   :  { %p476_p13 = por %p475_p12, %p474_p11 }
  0x1e   :  { %p477_p0 = pnand %p476_p13, %p470_p10 }
  0x20   :  { %480 = shalt.err (!%p477_p0)
}
  0x21   :  { %48 = dma.hbm_to_vmem [thread:$0]  %s566_s3, 1024, %s43_s28, [#allocation6], %s508_s21, %s508_s21, %s509_s22  }
  0x22   :  { %501 = dma.done.wait [#allocation3], 128  }
  0x23   :  { %502 = vsyncadd [#allocation3], 4294967168 }
  0x24   :  { %503 = dma.done.wait [#allocation6], 2048  }
  0x25   :  { %504 = vsyncadd [#allocation6], 4294965248  ;;  %v512_v0 = vmov 0.0   ;;  %vm513_vm0 = vmmov 0   ;;  %v401_v1 = vld [vmem:[#allocation5 + $0x38] sm:$0xff]   ;;  %v402_v2 = vld [vmem:[#allocation5 + $0x30] sm:$0xff]  }
  0x26   :  { %353 = vmatprep.subr.bf16.mxu0 %v512_v0  ;;  %369 = vmatprep.mubr.msk.bf16.mxu0 %vm513_vm0, %v512_v0  ;;  %v403_v3 = vld [vmem:[#allocation5 + $0x28] sm:$0xff]   ;;  %v404_v4 = vld [vmem:[#allocation5 + $0x20] sm:$0xff]   ;;  %v405_v5 = vld [vmem:[#allocation5 + $0x18] sm:$0xff]   ;;  %s514_s10 = smov [#allocation8]  }
  0x27   :  { %373 = vmatprep.subr.bf16.mxu1 %v512_v0  ;;  %389 = vmatprep.mubr.msk.bf16.mxu1 %vm513_vm0, %v512_v0  ;;  %v406_v6 = vld [vmem:[#allocation5 + $0x10] sm:$0xff]   ;;  %v407_v7 = vld [vmem:[#allocation5 + $0x8] sm:$0xff]   ;;  %v408_v8 = vld [vmem:[#allocation5] sm:$0xff]   ;;  %s307_s11 = sshll.u32 %s514_s10, 4  ;;  %s308_s11 = int_to_ptr.vmem [resolvable:$true] %s307_s11 }
  0x28   :  { %354 = vmatpush3.bf16.msra.mxu0 %v401_v1  ;;  %v61_v9 = vld [vmem:[#allocation2] sm:$0xff]  ;;  %v410_v12 = vld [vmem:[#allocation7 + $0x30] sm:$0xff]   ;;  %v411_v13 = vld [vmem:[#allocation7 + $0x28] sm:$0xff]   ;;  %s481_s12 = scalar_lea.vmem %s308_s11, 128  ;;  %p486_p2 = scmp.lt.s32.totalorder %s308_s11, %s308_s11 }
  0x29   :  { %355 = vmatprep.subr.bf16.mxu0 %v512_v0  ;;  %v62_v10 = vpack.c.bf16 %v61_v9, %v61_v9  ;;  %v409_v11 = vld [vmem:[#allocation7 + $0x38] sm:$0xff]   ;;  %v412_v22 = vld [vmem:[#allocation7 + $0x20] sm:$0xff]   ;;  %v414_v24 = vld [vmem:[#allocation7 + $0x10] sm:$0xff]   ;;  %p482_p1 = scmp.ne.s32.totalorder %s308_s11, %s481_s12  ;;  %p487_p3 = scmp.lt.s32.totalorder %s481_s12, %s481_s12 }
  0x2a   :  { %374 = vmatpush3.bf16.msra.mxu1 %v409_v11  ;;  %v317_v14 = vld [vmem:[%s565_s2] ss:$0 sm:$0xff]  ;;  %v415_v25 = vld [vmem:[#allocation7 + $0x8] sm:$0xff]   ;;  %v416_v26 = vld [vmem:[#allocation7] sm:$0xff]  }
  0x2b   :  { %375 = vmatprep.subr.bf16.mxu1 %v512_v0  ;;  %v413_v23 = vld [vmem:[#allocation7 + $0x18] sm:$0xff]   ;;  %p488_p4 = por %p487_p3, %p486_p2 }
  0x2c   :  { %356 = vmatpush3.bf16.msra.mxu0 %v402_v2  ;;  %v326_v32 = vld [vmem:[%s567_s4] ss:$0 sm:$0xff] }
  0x2d   :  { %357 = vmatprep.subr.bf16.mxu0 %v512_v0  ;;  %p489_p5 = pnand %p488_p4, %p482_p1 }
  0x2e   :  { %376 = vmatpush3.bf16.msra.mxu1 %v410_v12 }
  0x2f   :  { %377 = vmatprep.subr.bf16.mxu1 %v512_v0 }
  0x30   :  { %358 = vmatpush3.bf16.msra.mxu0 %v403_v3 }
  0x31   :  { %359 = vmatprep.subr.bf16.mxu0 %v512_v0 }
  0x32   :  { %378 = vmatpush3.bf16.msra.mxu1 %v411_v13 }
  0x33   :  { %379 = vmatprep.subr.bf16.mxu1 %v512_v0 }
  0x34   :  { %360 = vmatpush3.bf16.msra.mxu0 %v404_v4 }
  0x35   :  { %361 = vmatprep.subr.bf16.mxu0 %v512_v0 }
  0x36   :  { %380 = vmatpush3.bf16.msra.mxu1 %v412_v22 }
  0x37   :  { %381 = vmatprep.subr.bf16.mxu1 %v512_v0 }
  0x38   :  { %362 = vmatpush3.bf16.msra.mxu0 %v405_v5 }
  0x39   :  { %363 = vmatprep.subr.bf16.mxu0 %v512_v0 }
  0x3a   :  { %382 = vmatpush3.bf16.msra.mxu1 %v413_v23 }
  0x3b   :  { %383 = vmatprep.subr.bf16.mxu1 %v512_v0 }
  0x3c   :  { %364 = vmatpush3.bf16.msra.mxu0 %v406_v6 }
  0x3d   :  { %365 = vmatprep.subr.bf16.mxu0 %v512_v0 }
  0x3e   :  { %384 = vmatpush3.bf16.msra.mxu1 %v414_v24 }
  0x3f   :  { %385 = vmatprep.subr.bf16.mxu1 %v512_v0 }
  0x40   :  { %366 = vmatpush3.bf16.msra.mxu0 %v407_v7 }
  0x41   :  { %367 = vmatprep.subr.bf16.mxu0 %v512_v0 }
  0x42   :  { %386 = vmatpush3.bf16.msra.mxu1 %v415_v25 }
  0x43   :  { %387 = vmatprep.subr.bf16.mxu1 %v512_v0 }
  0x44   :  { %368 = vmatpush3.bf16.msra.mxu0 %v408_v8 }
  0x46   :  { %388 = vmatpush3.bf16.msra.mxu1 %v416_v26 }
  0x47   :  { %370 = vmatmul.mubr.bf16.vlgmr.msra.gmra.mxu0 %v62_v10 }
 0x107   :  { %v185_v15 = vpop.f32.mrf.mxu0 }
 0x108   :  { %v186_v16 = vadd.f32 %v317_v14, %v185_v15 }
 0x109   :  { %v371_v17 = vpop.f32.mrf.mxu0 }
 0x10a   :  { %v191_v18 = vmax.f32 %v186_v16, 0.0 }
 0x10b   :  { %v188_v19 = vpop.f32.mrf.mxu0 }
 0x10c   :  { %v192_v20 = vmul.f32 %v191_v18, %v191_v18 }
 0x10d   :  { %v372_v21 = vpop.f32.mrf.mxu0 }
 0x10e   :  { %193 = vadd.xlane.f32.xlu0 %v192_v20 }
 0x197   :  { %v194_v27 = vpop.xlane.xlu0 %193 }
 0x198   :  { %v195_v28 = vmax.f32 %v194_v27, 1e-24 }
 0x19a   :  { %417 = vrsqrt.f32 %v195_v28 }
 0x1a7   :  { %v418_v29 = vpop.eup %417 }
 0x1a8   :  { %v197_v30 = vmul.f32 %v418_v29, %v191_v18 }
 0x1aa   :  { %v198_v31 = vpack.c.bf16 %v197_v30, %v197_v30 }
 0x1ac   :  { %390 = vmatmul.mubr.bf16.vlgmr.msra.gmra.mxu1 %v198_v31 }
 0x26c   :  { %v287_v33 = vpop.f32.mrf.mxu1 }
 0x26d   :  { %v288_v34 = vadd.f32 %v326_v32, %v287_v33 }
 0x26e   :  { %v391_v35 = vpop.f32.mrf.mxu1 }
 0x26f   :  { %v293_v36 = vmax.f32 %v288_v34, 0.0 }
 0x270   :  { %v290_v37 = vpop.f32.mrf.mxu1 }
 0x271   :  { %v294_v38 = vmul.f32 %v293_v36, %v293_v36 }
 0x272   :  { %v392_v39 = vpop.f32.mrf.mxu1 }
 0x273   :  { %295 = vadd.xlane.f32.xlu0 %v294_v38 }
 0x2fc   :  { %v296_v40 = vpop.xlane.xlu0 %295 }
 0x2fd   :  { %v297_v41 = vmax.f32 %v296_v40, 1e-24 }
 0x2ff   :  { %419 = vrsqrt.f32 %v297_v41 }
 0x30c   :  { %v420_v42 = vpop.eup %419 }
 0x30d   :  { %v299_v43 = vmul.f32 %v420_v42, %v293_v36 }
 0x30f   :  { %300 = vst [vmem:[#allocation8] sm:$0xff] %v299_v43 }
 0x310   :  { %492 = shalt.err (!%p489_p5)
}
 0x311   :  { %310 = dma.vmem_to_hbm [thread:$0]  %s308_s11, 128, %s568_s5, [#allocation4]  }
 0x312   :  { %505 = dma.done.wait [#allocation4], 128  }
 0x313   :  { %506 = vsyncadd [#allocation4], 4294967168 }
 0x314   :  { %314 = vsyncpa [#allocation3], 1 }
 0x315   :  { %315 = vsyncpa [#allocation6], 1 }
 0x316   :  { %316 = vsyncpa [#allocation4], 1 }

</bundles_post_ra>
